<compile_context>
chip_gen: v7x
topology: tpu7x:2x2x1
jax: 0.10.0
libtpu: 0.0.40
codegen_flags: <defaults>
</compile_context>

<pallas_src>
import functools

import jax
import jax.numpy as jnp
from jax.experimental import pallas as pl
from jax.experimental.pallas import tpu as pltpu


def _cdiv(a, b):
    return -(-a // b)


def _round_up(a, b):
    return _cdiv(a, b) * b


# ---------------------------------------------------------------------------
# Pallas kernel: per-mode complex matmul for a block of modes.
# ---------------------------------------------------------------------------
def _compl_mul_block_kernel(x_ref, w_ref, o_ref, *, bp):
    """Complex per-mode matmul, Re/Im stacked along sublane-aligned rows.

    x_ref : (LB, 2*Bp, CKP)   rows [0:Bp) = Re(x_fft), rows [Bp:2Bp) = Im(x_fft)
    w_ref : (2, LB, CKP, CKP) [0] = W_re, [1] = W_im, (mode, in, out) layout
    o_ref : (LB, 2*Bp, CKP)   rows [0:Bp) = Re(out),  rows [Bp:2Bp) = Im(out)

    Bp is a multiple of 8 and CKP a multiple of 128, so all slices below are
    sublane/lane aligned and both stores are unmasked, lane-dense vst.
    """
    x = x_ref[...]                      # (LB, 2Bp, CKP) compute dtype (bf16/f32)
    wr = w_ref[0]                       # (LB, CKP, CKP)
    wi = w_ref[1]

    # Two batched MXU matmuls give all four real products (f32 accumulation):
    #   pr rows: [xr@Wr ; xi@Wr],  pi rows: [xr@Wi ; xi@Wi]
    pr = jnp.einsum('lbi,lio->lbo', x, wr, preferred_element_type=jnp.float32)
    pi = jnp.einsum('lbi,lio->lbo', x, wi, preferred_element_type=jnp.float32)

    # out_re = xr@Wr - xi@Wi ; out_im = xr@Wi + xi@Wr   (whole-vreg VPU combine)
    o_ref[:, :bp, :] = pr[:, :bp, :] - pi[:, bp:, :]
    o_ref[:, bp:, :] = pi[:, :bp, :] + pr[:, bp:, :]


def _choose_mode_block(l, rows, ckp, in_itemsize,
                       budget_bytes=12 * 1024 * 1024,
                       target_grid_steps=4):
    """Pick modes-per-block from PADDED tile dims, counting all VMEM users.

    Per-mode footprint (bytes):
      x block   : double-buffered, rows x CKP, compute dtype
      w block   : double-buffered, 2 (re/im) x CKP x CKP, compute dtype
      out block : double-buffered, rows x CKP, f32
      pr/pi     : 2 x rows x CKP f32 matmul intermediates
    The conservative 12 MiB budget leaves headroom under v5e's 16 MiB default
    scoped VMEM and v7x's 64 MiB physical VMEM; the pallas_call raises
    vmem_limit_bytes to 32 MiB explicitly, consistent with this budget.
    """
    per_mode = (2 * rows * ckp * in_itemsize          # x (double-buffered)
                + 2 * 2 * ckp * ckp * in_itemsize     # weights re+im (double-buffered)
                + 2 * rows * ckp * 4                  # out f32 (double-buffered)
                + 2 * rows * ckp * 4)                 # pr + pi f32 temps
    lb = max(1, min(l, budget_bytes // per_mode))
    # Never collapse to grid=(1,): keep >= target_grid_steps mode-blocks so v7x's
    # two TensorCores get work and the weight DMA stream overlaps compute.
    if l >= target_grid_steps:
        lb = min(lb, _cdiv(l, target_grid_steps))
    lp = _round_up(l, lb)
    return int(lb), int(lp)


def compl_mul1d_pallas(x_stk, w_stk, bp, lb, *, vmem_limit_bytes=32 * 1024 * 1024):
    """x_stk: (Lp, 2*Bp, CKP); w_stk: (2, Lp, CKP, CKP) -> (Lp, 2*Bp, CKP) f32."""
    lp, rows, ckp = x_stk.shape
    grid = (lp // lb,)

    x_spec = pl.BlockSpec((lb, rows, ckp), lambda m: (m, 0, 0))
    w_spec = pl.BlockSpec((2, lb, ckp, ckp), lambda m: (0, m, 0, 0))
    o_spec = pl.BlockSpec((lb, rows, ckp), lambda m: (m, 0, 0))

    return pl.pallas_call(
        functools.partial(_compl_mul_block_kernel, bp=bp),
        out_shape=jax.ShapeDtypeStruct((lp, rows, ckp), jnp.float32),
        grid_spec=pltpu.PrefetchScalarGridSpec(
            num_scalar_prefetch=0,
            grid=grid,
            in_specs=[x_spec, w_spec],
            out_specs=o_spec,
        ),
        compiler_params=pltpu.CompilerParams(
            # Mode-blocks are independent -> shard across v7x's two TensorCores.
            dimension_semantics=("parallel",),
            vmem_limit_bytes=vmem_limit_bytes,
        ),
    )(x_stk, w_stk)


def prepare_weights(weights1, weights2, compute_dtype=jnp.bfloat16, mode_align=8):
    """One-time relayout of the module parameters for the Pallas kernel.

    (ck, ck, modes) x2 -> (2, Mp, CKP, CKP): mode-major, lane-padded to 128,
    modes padded to a multiple of `mode_align`, cast to the MXU compute dtype.
    Done once at init so the per-call forward never pays a weight relayout.
    """
    ck_in, ck_out, modes = weights1.shape
    assert ck_in == ck_out, "sparseKernelFT1d uses square (c*k, c*k) weights"
    ckp = _round_up(ck_in, 128)
    mp = _round_up(modes, mode_align)
    w = jnp.stack([weights1, weights2], axis=0)          # (2, i, o, m)
    w = jnp.transpose(w, (0, 3, 1, 2))                   # (2, m, i, o) mode-major
    w = jnp.pad(w, ((0, 0), (0, mp - modes), (0, ckp - ck_in), (0, ckp - ck_out)))
    return w.astype(compute_dtype)


@functools.partial(jax.jit, static_argnums=2)
def sparse_kernel_ft1d_forward(x, w_prep, modes1):
    """x: (B, N, c, k) float32; w_prep: output of prepare_weights(weights1, weights2)."""
    B, N, c, k = x.shape
    ck = c * k
    half = N // 2 + 1
    l = min(modes1, half)

    ckp = w_prep.shape[-1]              # lane-padded c*k
    bp = _round_up(B, 8)                # sublane-aligned Re/Im split point
    rows = 2 * bp

    # (B, N, c, k) -> (B, N, ck) -> (B, ck, N)
    xv = x.reshape(B, N, ck).transpose(0, 2, 1)

    # TODO(synk): rfft/irfft stay in plain JAX (no Pallas FFT primitive).
    x_fft = jnp.fft.rfft(xv, axis=-1)                    # (B, ck, half) complex64

    # Truncate to l modes BEFORE any relayout, then go mode-major.
    xf = x_fft[:, :, :l]
    xr = jnp.real(xf).transpose(2, 0, 1)                 # (l, B, ck)
    xi = jnp.imag(xf).transpose(2, 0, 1)

    lb, lp = _choose_mode_block(l, rows, ckp, jnp.dtype(w_prep.dtype).itemsize)

    pad = ((0, lp - l), (0, bp - B), (0, ckp - ck))
    x_stk = jnp.concatenate([jnp.pad(xr, pad), jnp.pad(xi, pad)], axis=1)
    x_stk = x_stk.astype(w_prep.dtype)                   # (lp, 2*bp, ckp)

    # Weights are already mode-major / padded / cast: a leading-axis slice is free.
    mp = w_prep.shape[1]
    if lp <= mp:
        w_stk = w_prep[:, :lp]
    else:  # rare: more mode-blocks than prepared modes; zero-pad (output is discarded there)
        w_stk = jnp.pad(w_prep, ((0, 0), (0, lp - mp), (0, 0), (0, 0)))

    out = compl_mul1d_pallas(x_stk, w_stk, bp, lb)       # (lp, 2*bp, ckp) f32

    # Re-assemble the truncated spectrum; zero-pad up to N//2+1 modes (pad, not scatter).
    out_re = out[:l, :B, :ck]
    out_im = out[:l, bp:bp + B, :ck]
    out_c = jax.lax.complex(out_re, out_im).transpose(1, 2, 0)   # (B, ck, l)
    out_ft = jnp.pad(out_c, ((0, 0), (0, 0), (0, half - l)))

    y = jnp.fft.irfft(out_ft, n=N, axis=-1)              # (B, ck, N) float32
    return y.transpose(0, 2, 1).reshape(B, N, c, k)


def make_params(key, c, k, modes1):
    ck = c * k
    scale = 1.0 / (ck * ck)
    k1, k2 = jax.random.split(key)
    w1 = scale * jax.random.uniform(k1, (ck, ck, modes1), dtype=jnp.float32)
    w2 = scale * jax.random.uniform(k2, (ck, ck, modes1), dtype=jnp.float32)
    return w1, w2


def _reference_forward(x, w1, w2, modes1):
    # Pure-JAX reference (mirrors the PyTorch code path) for a correctness check.
    B, N, c, k = x.shape
    ck = c * k
    xv = x.reshape(B, N, ck).transpose(0, 2, 1)
    x_fft = jnp.fft.rfft(xv, axis=-1)
    half = N // 2 + 1
    l = min(modes1, half)
    w = (w1 + 1j * w2)[:, :, :l]
    out_ft = jnp.zeros((B, ck, half), dtype=jnp.complex64)
    out_ft = out_ft.at[:, :, :l].set(jnp.einsum('bix,iox->box', x_fft[:, :, :l], w))
    y = jnp.fft.irfft(out_ft, n=N, axis=-1)
    return y.transpose(0, 2, 1).reshape(B, N, c, k)


if __name__ == "__main__":
    key = jax.random.PRNGKey(0)

    # ---- Small shapes consistent with the module's forward: x is (B, N, c, k).
    B, N, c, k = 2, 16, 4, 8          # ck = 32, N//2+1 = 9
    modes1 = 8                        # alpha; l = min(8, 9) = 8

    kx, kp, kx2, kp2 = jax.random.split(key, 4)
    x = jax.random.normal(kx, (B, N, c, k), dtype=jnp.float32)
    w1, w2 = make_params(kp, c, k, modes1)
    ref = jax.block_until_ready(_reference_forward(x, w1, w2, modes1))

    # f32 compute path (tight tolerance).
    w_prep_f32 = prepare_weights(w1, w2, compute_dtype=jnp.float32)
    out_f32 = jax.block_until_ready(sparse_kernel_ft1d_forward(x, w_prep_f32, modes1))
    assert out_f32.shape == (B, N, c, k)
    assert jnp.allclose(out_f32, ref, rtol=1e-4, atol=1e-4), "f32 mismatch vs reference"

    # bf16 MXU path (production default; f32 accumulation inside the kernel).
    w_prep_bf16 = prepare_weights(w1, w2, compute_dtype=jnp.bfloat16)
    out_bf16 = jax.block_until_ready(sparse_kernel_ft1d_forward(x, w_prep_bf16, modes1))
    assert out_bf16.shape == (B, N, c, k)
    assert jnp.allclose(out_bf16, ref, rtol=2e-2, atol=2e-3), "bf16 mismatch vs reference"

    # ---- Medium shape: exercises ck == 128 lanes exactly, multiple grid steps, B = 8.
    B2, N2, c2, k2 = 8, 64, 16, 8     # ck = 128, N//2+1 = 33
    modes2 = 32
    x2 = jax.random.normal(kx2, (B2, N2, c2, k2), dtype=jnp.float32)
    w1b, w2b = make_params(kp2, c2, k2, modes2)
    ref2 = jax.block_until_ready(_reference_forward(x2, w1b, w2b, modes2))
    w_prep2 = prepare_weights(w1b, w2b, compute_dtype=jnp.bfloat16)
    out2 = jax.block_until_ready(sparse_kernel_ft1d_forward(x2, w_prep2, modes2))
    assert out2.shape == (B2, N2, c2, k2)
    assert jnp.allclose(out2, ref2, rtol=2e-2, atol=2e-3), "bf16 medium-shape mismatch"

    print("KERNEL_OK")
</pallas_src>

<mosaic_0001>
module attributes {stable_mosaic.version = 11 : i64} {
  func.func @_compl_mul_block_kernel(%arg0: i32, %arg1: memref<2x16x128xf32, #tpu.memory_space<vmem>>, %arg2: memref<2x2x128x128xf32, #tpu.memory_space<vmem>>, %arg3: memref<2x16x128xf32, #tpu.memory_space<vmem>>) attributes {dimension_semantics = [#tpu.dimension_semantics<parallel>], iteration_bounds = array<i64: 4>, scalar_prefetch = 0 : i64, scratch_operands = 0 : i64, tpu.core_type = #tpu.core_type<tc>, window_params = [{transform_indices = @transform_0, window_bounds = array<i64: 2, 16, 128>}, {transform_indices = @transform_1, window_bounds = array<i64: 2, 2, 128, 128>}, {transform_indices = @transform_2, window_bounds = array<i64: 2, 16, 128>}]} {
    %c0 = arith.constant 0 : index
    %c0_0 = arith.constant 0 : index
    %c0_1 = arith.constant 0 : index
    %0 = vector.load %arg1[%c0, %c0_0, %c0_1] : memref<2x16x128xf32, #tpu.memory_space<vmem>>, vector<2x16x128xf32>
    %c0_2 = arith.constant 0 : index
    %c0_3 = arith.constant 0 : index
    %c0_4 = arith.constant 0 : index
    %c0_5 = arith.constant 0 : index
    %1 = vector.load %arg2[%c0_2, %c0_3, %c0_4, %c0_5] : memref<2x2x128x128xf32, #tpu.memory_space<vmem>>, vector<1x2x128x128xf32>
    %2 = vector.shape_cast %1 : vector<1x2x128x128xf32> to vector<2x128x128xf32>
    %c1 = arith.constant 1 : index
    %c0_6 = arith.constant 0 : index
    %c0_7 = arith.constant 0 : index
    %c0_8 = arith.constant 0 : index
    %3 = vector.load %arg2[%c1, %c0_6, %c0_7, %c0_8] : memref<2x2x128x128xf32, #tpu.memory_space<vmem>>, vector<1x2x128x128xf32>
    %4 = vector.shape_cast %3 : vector<1x2x128x128xf32> to vector<2x128x128xf32>
    "tpu.trace_start"() <{level = 10 : i32, message = "lbi,lio->lbo"}> : () -> ()
    %cst = arith.constant dense<0.000000e+00> : vector<2x16x128xf32>
    %5 = tpu.matmul %0, %2, %cst {dimension_numbers = #tpu.dot_dimension_numbers<[2], [1], [1], [2], [0, 0, 0, 1, 1, 2], [0], [0]>} : vector<2x16x128xf32>, vector<2x128x128xf32>, vector<2x16x128xf32> -> vector<2x16x128xf32>
    %cst_9 = arith.constant dense<0.000000e+00> : vector<2x16x128xf32>
    %6 = tpu.matmul %0, %4, %cst_9 {dimension_numbers = #tpu.dot_dimension_numbers<[2], [1], [1], [2], [0, 0, 0, 1, 1, 2], [0], [0]>} : vector<2x16x128xf32>, vector<2x128x128xf32>, vector<2x16x128xf32> -> vector<2x16x128xf32>
    "tpu.trace_stop"() : () -> ()
    %7 = vector.extract_strided_slice %5 {offsets = [0, 0, 0], sizes = [2, 8, 128], strides = [1, 1, 1]} : vector<2x16x128xf32> to vector<2x8x128xf32>
    %8 = vector.extract_strided_slice %6 {offsets = [0, 8, 0], sizes = [2, 8, 128], strides = [1, 1, 1]} : vector<2x16x128xf32> to vector<2x8x128xf32>
    %9 = arith.subf %7, %8 : vector<2x8x128xf32>
    %c0_10 = arith.constant 0 : index
    %c0_11 = arith.constant 0 : index
    %c0_12 = arith.constant 0 : index
    %10 = vector.load %arg3[%c0_10, %c0_11, %c0_12] : memref<2x16x128xf32, #tpu.memory_space<vmem>>, vector<2x8x128xf32>
    tpu.vector_store %arg3[%c0_10, %c0_11, %c0_12], %9 {strides = array<i32>} : memref<2x16x128xf32, #tpu.memory_space<vmem>>, vector<2x8x128xf32>,
    %11 = vector.extract_strided_slice %6 {offsets = [0, 0, 0], sizes = [2, 8, 128], strides = [1, 1, 1]} : vector<2x16x128xf32> to vector<2x8x128xf32>
    %12 = vector.extract_strided_slice %5 {offsets = [0, 8, 0], sizes = [2, 8, 128], strides = [1, 1, 1]} : vector<2x16x128xf32> to vector<2x8x128xf32>
    %13 = arith.addf %11, %12 : vector<2x8x128xf32>
    %c0_13 = arith.constant 0 : index
    %c8 = arith.constant 8 : index
    %c0_14 = arith.constant 0 : index
    %14 = vector.load %arg3[%c0_13, %c8, %c0_14] : memref<2x16x128xf32, #tpu.memory_space<vmem>>, vector<2x8x128xf32>
    tpu.vector_store %arg3[%c0_13, %c8, %c0_14], %13 {strides = array<i32>} : memref<2x16x128xf32, #tpu.memory_space<vmem>>, vector<2x8x128xf32>,
    return
  }
  func.func @transform_0(%arg0: i32) -> (i32, i32, i32) {
    %c0_i32 = arith.constant 0 : i32
    %c0_i32_0 = arith.constant 0 : i32
    %c0_i32_1 = arith.constant 0 : i32
    return %arg0, %c0_i32, %c0_i32_0 : i32, i32, i32
  }
  func.func @transform_1(%arg0: i32) -> (i32, i32, i32, i32) {
    %c0_i32 = arith.constant 0 : i32
    %c0_i32_0 = arith.constant 0 : i32
    %c0_i32_1 = arith.constant 0 : i32
    %c0_i32_2 = arith.constant 0 : i32
    return %c0_i32, %arg0, %c0_i32_0, %c0_i32_1 : i32, i32, i32, i32
  }
  func.func @transform_2(%arg0: i32) -> (i32, i32, i32) {
    %c0_i32 = arith.constant 0 : i32
    %c0_i32_0 = arith.constant 0 : i32
    %c0_i32_1 = arith.constant 0 : i32
    return %arg0, %c0_i32, %c0_i32_0 : i32, i32, i32
  }
}

</mosaic_0001>

<bundles_post_ra>
// kernel: reverse.1
= control target key start
LH: loop header
LB: loop body
LE: loop exit
PB: predicated region body
PF: predicated region fallthrough
CT: control target
= control target key end

     0   :  { %s92_s0 = inlined_call_operand.vmem [shape: f32[2,32,7], index: 0, kind: input, shape index: {}]   ;;  %s93_s1 = inlined_call_operand.vmem [shape: f32[2,32,7], index: 1, kind: output, shape index: {}]  }
   0x1   :  { %v28_v0 = vld [vmem:[%s92_s0 + $0xc] sm:$0x3]  ;;  %v29_v1 = vld [vmem:[%s92_s0 + $0xa] sm:$0x3]  ;;  %v31_v2 = vld [vmem:[%s92_s0 + $0x8] sm:$0x3] }
   0x2   :  { %4 = vst [vmem:[%s93_s1] sm:$0x3] %v28_v0  ;;  %30 = vst [vmem:[%s93_s1 + $0x2] sm:$0x3] %v29_v1  ;;  %v33_v3 = vld [vmem:[%s92_s0 + $0x6] sm:$0x3] }
   0x3   :  { %32 = vst [vmem:[%s93_s1 + $0x4] sm:$0x3] %v31_v2  ;;  %v35_v4 = vld [vmem:[%s92_s0 + $0x4] sm:$0x3]  ;;  %v37_v5 = vld [vmem:[%s92_s0 + $0x2] sm:$0x3] }
   0x4   :  { %34 = vst [vmem:[%s93_s1 + $0x6] sm:$0x3] %v33_v3  ;;  %36 = vst [vmem:[%s93_s1 + $0x8] sm:$0x3] %v35_v4  ;;  %v25_v6 = vld [vmem:[%s92_s0] sm:$0x3] }
   0x5   :  { %38 = vst [vmem:[%s93_s1 + $0xa] sm:$0x3] %v37_v5  ;;  %39 = vst [vmem:[%s93_s1 + $0xc] sm:$0x3] %v25_v6 }

// kernel: sparse_kernel_ft1d_forward.1
= control target key start
LH: loop header
LB: loop body
LE: loop exit
PB: predicated region body
PF: predicated region fallthrough
CT: control target
= control target key end

     0   :  { %7 = vsyncpa [#allocation3], 0  ;;  %s1364_s0 = inlined_call_operand.vmem [shape: f32[8,16,128], index: 0, kind: input, shape index: {}]   ;;  %s1365_s1 = inlined_call_operand.hbm [shape: f32[2,8,128,128], index: 1, kind: input, shape index: {}]   ;;  %s1366_s2 = inlined_call_operand.vmem [shape: f32[8,16,128], index: 2, kind: output, shape index: {}]  }
   0x1   :  { %9 = vsyncpa [#allocation3 + $0x1], 0  ;;  %s1177_s9 = smov 0   ;;  %s1179_s10 = smov 0  }
   0x2   :  { %s1181_s11 = smov 0   ;;  %s1183_s12 = smov 0  }
   0x3 LB: > { %s677_s13 = sadd.s32 4294967295, %s1154_s12   ;;  %s1197_s14 = sadd.s32 1, %s1154_s12   ;;  %s1154_s12 = sphi %s1183_s12, %s1372_s12   ;;  %s1150_s11 = sphi %s1181_s11, %s1371_s11   ;;  %s1146_s10 = sphi %s1179_s10, %s1370_s10   ;;  %s1142_s9 = sphi %s1177_s9, %s1369_s9  }
   0x4   : > { %s45_s15 = ssub.s32 %s1154_s12, %s1197_s14  ;;  %s48_s16 = sadd.s32 1, %s1150_s11 }
   0x5   : > { %p46_p0 = scmp.eq.s32.totalorder %s45_s15, 0  ;;  %p55_p1 = scmp.ne.s32.totalorder %s1150_s11, %s1146_s10 }
   0x6   : > { %p56_p2 = scmp.eq.s32.totalorder %s1154_s12, 0  ;;  %p61_p3 = scmp.ne.s32.totalorder %s1146_s10, %s1142_s9 }
   0x7   : > { %s1207_s17 = scalar_select %p46_p0, %s1150_s11, %s48_s16  }
   0x8   : > { %p1209_p4 = por %p56_p2, %p55_p1  ;;  %p62_p5 = scmp.eq.s32.totalorder %s677_s13, 0 }
   0x9   : > { %p680_p7 = scmp.ge.s32.totalorder %s1154_s12, 4 }
   0xa   : > { %p1215_p6 = por %p62_p5, %p61_p3 }
   0xb   : > { %107 = sbr.rel (%p680_p7) target bundleno = 31 (0x1f), region = 16 }
  0x12   : > { %s121_s20 = sand.u32 1, %s1150_s11   ;;  %s730_s21 = sshll.u32 %s1154_s12, 12 }
  0x13   : > { %s681_s22 = sshll.u32 %s121_s20, 9  ;;  %s132_s25 = scalar_lea.hbm %s1365_s1, %s730_s21 }
  0x14   : > { %s1073_s26 = scalar_select %p1209_p4, [#allocation0], [#allocation6] }
  0x15   : > { %s125_s27 = scalar_lea.vmem [#allocation2], %s681_s22  ;;  %s1156_s30 = smov 16384  }
  0x16   : > { %s145_s28 = sshll.u32 %s125_s27, 4  ;;  %s137_s29 = sld [smem:[%s1073_s26]]   ;;  %s146_s28 = int_to_ptr.vmem [resolvable:$true] %s145_s28 }
  0x17   : > { %1074 = sst [smem:[#allocation5]] (%p1209_p4), %s1156_s30  ;;  %s1157_s3 = smov 4096  }
  0x18   : > { %1075 = sst [smem:[#allocation5 + $0x1]] (%p1209_p4), %s1157_s3  ;;  %s1158_s4 = smov 32  }
  0x19   : > { %1076 = sst [smem:[#allocation5 + $0x2]] (%p1209_p4), %s1158_s4  ;;  %s1159_s5 = smov 128  }
  0x1a   : > { %1077 = sst [smem:[#allocation5 + $0x3]] (%p1209_p4), %s1159_s5  ;;  %s1160_s7 = smov 8  }
  0x1b   : > { %1078 = sst [smem:[#allocation5 + $0x4]] (%p1209_p4), %s1159_s5  ;;  %s122_s9 = scalar_lea.sflag [#allocation3], %s121_s20 }
  0x1c   : > { %s685_s6 = sshll.u32 %s137_s29, 26  ;;  %1079 = sst [smem:[#allocation5 + $0x5]] (%p1209_p4), %s1160_s7 }
  0x1d   : > { %s686_s8 = sadd.s32 134217728, %s685_s6  ;;  %s1161_s15 = smov [#allocation4]  }
  0x1e   : > { %1080 = dma.general (%p1209_p4), %s132_s25, 8192, %s146_s28, %s122_s9, %s1161_s15, [#allocation5], %s686_s8, 0  }
  0x1f PF: > { %p687_p8 = scmp.ge.s32.totalorder %s1154_s12, 1  ;;  %p166_p9 = scmp.lt.s32.totalorder %s1154_s12, 5 }
  0x21   : > { %p167_p10 = pnand %p687_p8, %p166_p9 }
  0x22   : > { %s172_s16 = sand.u32 (!%p167_p10), 1, %s1146_s10  }
  0x23   : > { %170 = sbr.rel (%p167_p10) target bundleno = 327 (0x147), region = 28  ;;  %s688_s21 = sshll.u32 (!%p167_p10), %s172_s16, 9 }
  0x24   : > { %s173_s22 = scalar_lea.sflag (!%p167_p10), [#allocation3], %s172_s16  ;;  %s1244_s23 = scalar_lea.vmem (!%p167_p10), [#allocation2], %s688_s21 }
  0x2a   : > { %1137 = dma.done.wait (%p1215_p6), %s173_s22, 8192  }
  0x2b   : > { %1139 = vsyncadd (%p1215_p6), %s173_s22, 4294959104  ;;  %s689_s18 = sshll.u32 %s677_s13, 1  ;;  %v223_v0 = vld [vmem:[%s1244_s23] sm:$0xff]  ;;  %v224_v1 = vld [vmem:[%s1244_s23 + $0x8] sm:$0xff] }
  0x2c   : > { %p205_p11 = scmp.lt.s32.totalorder %s689_s18, 7  ;;  %v239_v2 = vld [vmem:[%s1244_s23 + $0x80] sm:$0xff]  ;;  %v945_v3 = vpack.c.bf16 %v224_v1, %v223_v0  ;;  %v240_v4 = vld [vmem:[%s1244_s23 + $0x88] sm:$0xff]  ;;  %v225_v5 = vld [vmem:[%s1244_s23 + $0x10] sm:$0xff] }
  0x2d   : > { %v226_v6 = vld [vmem:[%s1244_s23 + $0x18] sm:$0xff]  ;;  %v977_v7 = vpack.c.bf16 %v240_v4, %v239_v2  ;;  %v241_v9 = vld [vmem:[%s1244_s23 + $0x90] sm:$0xff]  ;;  %v227_v11 = vld [vmem:[%s1244_s23 + $0x20] sm:$0xff] }
  0x2e   : > { %s1374_s18 = smov (!%p205_p11, %s689_s18), 7  ;;  %v949_v8 = vpack.c.bf16 %v226_v6, %v225_v5  ;;  %v242_v10 = vld [vmem:[%s1244_s23 + $0x98] sm:$0xff]  ;;  %946 = vmatprep.subr.bf16.mxu0 %v945_v3  ;;  %v228_v13 = vld [vmem:[%s1244_s23 + $0x28] sm:$0xff]  ;;  %v243_v14 = vld [vmem:[%s1244_s23 + $0xa0] sm:$0xff] }
  0x2f   : > { %v981_v12 = vpack.c.bf16 %v242_v10, %v241_v9  ;;  %v244_v15 = vld [vmem:[%s1244_s23 + $0xa8] sm:$0xff]  ;;  %978 = vmatprep.subr.bf16.mxu1 %v977_v7  ;;  %948 = vmatpush3.bf16.msra.mxu0 %v945_v3  ;;  %s731_s12 = sshll.u32 %s1374_s18, 4  ;;  %v953_v16 = vpack.c.bf16 %v228_v13, %v227_v11  ;;  %v229_v18 = vld [vmem:[%s1244_s23 + $0x30] sm:$0xff]  ;;  %v230_v19 = vld [vmem:[%s1244_s23 + $0x38] sm:$0xff] }
  0x30   : > { %980 = vmatpush3.bf16.msra.mxu1 %v977_v7  ;;  %950 = vmatprep.subr.bf16.mxu0 %v949_v8  ;;  %v985_v17 = vpack.c.bf16 %v244_v15, %v243_v14  ;;  %v245_v20 = vld [vmem:[%s1244_s23 + $0xb0] sm:$0xff]  ;;  %v246_v21 = vld [vmem:[%s1244_s23 + $0xb8] sm:$0xff]  ;;  %s1276_s20 = scalar_lea.vmem %s1364_s0, %s731_s12  ;;  %v957_v22 = vpack.c.bf16 %v230_v19, %v229_v18  ;;  %v231_v24 = vld [vmem:[%s1244_s23 + $0x40] sm:$0xff]  ;;  %s217_s26 = scalar_lea.vmem %s1366_s2, %s731_s12 }
  0x31   : > { %982 = vmatprep.subr.bf16.mxu1 %v981_v12  ;;  %v989_v23 = vpack.c.bf16 %v246_v21, %v245_v20  ;;  %v232_v25 = vld [vmem:[%s1244_s23 + $0x48] sm:$0xff]  ;;  %v1281_v26 = vld [vmem:[%s1276_s20] sm:$0xff]  ;;  %v1287_v29 = vld [vmem:[%s1276_s20 + $0x10] sm:$0xff] }
  0x32   : > { %v247_v27 = vld [vmem:[%s1244_s23 + $0xc0] sm:$0xff]  ;;  %v248_v28 = vld [vmem:[%s1244_s23 + $0xc8] sm:$0xff]  ;;  %837 = vmatprep.mubr.f32.mxu0 %v1281_v26  ;;  %872 = vmatprep.mubr.f32.mxu1 %v1287_v29  ;;  %v961_v30 = vpack.c.bf16 %v232_v25, %v231_v24  ;;  %v233_v32 = vld [vmem:[%s1244_s23 + $0x50] sm:$0xff] }
  0x33   : > { %952 = vmatpush3.bf16.msra.mxu0 %v949_v8  ;;  %v993_v31 = vpack.c.bf16 %v248_v28, %v247_v27  ;;  %v234_v33 = vld [vmem:[%s1244_s23 + $0x58] sm:$0xff]  ;;  %v249_v34 = vld [vmem:[%s1244_s23 + $0xd0] sm:$0xff]  ;;  %v235_v38 = vld [vmem:[%s1244_s23 + $0x60] sm:$0xff] }
  0x34   : > { %984 = vmatpush3.bf16.msra.mxu1 %v981_v12  ;;  %954 = vmatprep.subr.bf16.mxu0 %v953_v16  ;;  %v250_v35 = vld [vmem:[%s1244_s23 + $0xd8] sm:$0xff]  ;;  %v965_v36 = vpack.c.bf16 %v234_v33, %v233_v32  ;;  %v236_v39 = vld [vmem:[%s1244_s23 + $0x68] sm:$0xff]  ;;  %v251_v40 = vld [vmem:[%s1244_s23 + $0xe0] sm:$0xff] }
  0x35   : > { %986 = vmatprep.subr.bf16.mxu1 %v985_v17  ;;  %v997_v37 = vpack.c.bf16 %v250_v35, %v249_v34  ;;  %v252_v41 = vld [vmem:[%s1244_s23 + $0xe8] sm:$0xff]  ;;  %v969_v42 = vpack.c.bf16 %v236_v39, %v235_v38  ;;  %v237_v44 = vld [vmem:[%s1244_s23 + $0x70] sm:$0xff]  ;;  %v238_v45 = vld [vmem:[%s1244_s23 + $0x78] sm:$0xff] }
  0x36   : > { %v1001_v43 = vpack.c.bf16 %v252_v41, %v251_v40  ;;  %v253_v46 = vld [vmem:[%s1244_s23 + $0xf0] sm:$0xff]  ;;  %v254_v47 = vld [vmem:[%s1244_s23 + $0xf8] sm:$0xff]  ;;  %v973_v48 = vpack.c.bf16 %v238_v45, %v237_v44  ;;  %v695_v50 = vld [vmem:[%s1244_s23 + $0x100] sm:$0xff] }
  0x37   : > { %956 = vmatpush3.bf16.msra.mxu0 %v953_v16  ;;  %v1005_v49 = vpack.c.bf16 %v254_v47, %v253_v46  ;;  %v696_v51 = vld [vmem:[%s1244_s23 + $0x108] sm:$0xff]  ;;  %v711_v52 = vld [vmem:[%s1244_s23 + $0x180] sm:$0xff]  ;;  %v697_v56 = vld [vmem:[%s1244_s23 + $0x110] sm:$0xff] }
  0x38   : > { %988 = vmatpush3.bf16.msra.mxu1 %v985_v17  ;;  %958 = vmatprep.subr.bf16.mxu0 %v957_v22  ;;  %v712_v53 = vld [vmem:[%s1244_s23 + $0x188] sm:$0xff]  ;;  %v1009_v54 = vpack.c.bf16 %v696_v51, %v695_v50  ;;  %v698_v57 = vld [vmem:[%s1244_s23 + $0x118] sm:$0xff]  ;;  %v713_v58 = vld [vmem:[%s1244_s23 + $0x190] sm:$0xff] }
  0x39   : > { %990 = vmatprep.subr.bf16.mxu1 %v989_v23  ;;  %v1041_v55 = vpack.c.bf16 %v712_v53, %v711_v52  ;;  %v714_v59 = vld [vmem:[%s1244_s23 + $0x198] sm:$0xff]  ;;  %v1311_v60 = vld [vmem:[%s1276_s20 + $0x8] sm:$0xff]  ;;  %v1013_v62 = vpack.c.bf16 %v698_v57, %v697_v56  ;;  %v699_v0 = vld [vmem:[%s1244_s23 + $0x120] sm:$0xff] }
  0x3a   : > { %v1314_v61 = vld [vmem:[%s1276_s20 + $0x18] sm:$0xff]  ;;  %v1045_v63 = vpack.c.bf16 %v714_v59, %v713_v58  ;;  %v700_v1 = vld [vmem:[%s1244_s23 + $0x128] sm:$0xff]  ;;  %v715_v2 = vld [vmem:[%s1244_s23 + $0x1a0] sm:$0xff] }
  0x3b   : > { %960 = vmatpush3.bf16.msra.mxu0 %v957_v22  ;;  %v716_v3 = vld [vmem:[%s1244_s23 + $0x1a8] sm:$0xff]  ;;  %v1017_v4 = vpack.c.bf16 %v700_v1, %v699_v0  ;;  %v701_v6 = vld [vmem:[%s1244_s23 + $0x130] sm:$0xff]  ;;  %v702_v7 = vld [vmem:[%s1244_s23 + $0x138] sm:$0xff] }
  0x3c   : > { %992 = vmatpush3.bf16.msra.mxu1 %v989_v23  ;;  %962 = vmatprep.subr.bf16.mxu0 %v961_v30  ;;  %v1049_v5 = vpack.c.bf16 %v716_v3, %v715_v2  ;;  %v717_v8 = vld [vmem:[%s1244_s23 + $0x1b0] sm:$0xff]  ;;  %v718_v9 = vld [vmem:[%s1244_s23 + $0x1b8] sm:$0xff]  ;;  %v1021_v10 = vpack.c.bf16 %v702_v7, %v701_v6  ;;  %v703_v12 = vld [vmem:[%s1244_s23 + $0x140] sm:$0xff] }
  0x3d   : > { %994 = vmatprep.subr.bf16.mxu1 %v993_v31  ;;  %v1053_v11 = vpack.c.bf16 %v718_v9, %v717_v8  ;;  %v704_v13 = vld [vmem:[%s1244_s23 + $0x148] sm:$0xff]  ;;  %v719_v14 = vld [vmem:[%s1244_s23 + $0x1c0] sm:$0xff]  ;;  %v705_v18 = vld [vmem:[%s1244_s23 + $0x150] sm:$0xff] }
  0x3e   : > { %v720_v15 = vld [vmem:[%s1244_s23 + $0x1c8] sm:$0xff]  ;;  %v1025_v16 = vpack.c.bf16 %v704_v13, %v703_v12  ;;  %v706_v19 = vld [vmem:[%s1244_s23 + $0x158] sm:$0xff]  ;;  %v721_v20 = vld [vmem:[%s1244_s23 + $0x1d0] sm:$0xff] }
  0x3f   : > { %964 = vmatpush3.bf16.msra.mxu0 %v961_v30  ;;  %v1057_v17 = vpack.c.bf16 %v720_v15, %v719_v14  ;;  %v722_v21 = vld [vmem:[%s1244_s23 + $0x1d8] sm:$0xff]  ;;  %v1029_v22 = vpack.c.bf16 %v706_v19, %v705_v18  ;;  %v707_v24 = vld [vmem:[%s1244_s23 + $0x160] sm:$0xff]  ;;  %v708_v25 = vld [vmem:[%s1244_s23 + $0x168] sm:$0xff] }
  0x40   : > { %996 = vmatpush3.bf16.msra.mxu1 %v993_v31  ;;  %966 = vmatprep.subr.bf16.mxu0 %v965_v36  ;;  %v1061_v23 = vpack.c.bf16 %v722_v21, %v721_v20  ;;  %v724_v27 = vld [vmem:[%s1244_s23 + $0x1e8] sm:$0xff]  ;;  %v1033_v28 = vpack.c.bf16 %v708_v25, %v707_v24  ;;  %v709_v30 = vld [vmem:[%s1244_s23 + $0x170] sm:$0xff]  ;;  %v710_v31 = vld [vmem:[%s1244_s23 + $0x178] sm:$0xff] }
  0x41   : > { %998 = vmatprep.subr.bf16.mxu1 %v997_v37  ;;  %v725_v32 = vld [vmem:[%s1244_s23 + $0x1f0] sm:$0xff]  ;;  %v726_v33 = vld [vmem:[%s1244_s23 + $0x1f8] sm:$0xff]  ;;  %v1037_v34 = vpack.c.bf16 %v710_v31, %v709_v30 }
  0x42   : > { %v1069_v35 = vpack.c.bf16 %v726_v33, %v725_v32 }
  0x43   : > { %968 = vmatpush3.bf16.msra.mxu0 %v965_v36 }
  0x44   : > { %1000 = vmatpush3.bf16.msra.mxu1 %v997_v37  ;;  %970 = vmatprep.subr.bf16.mxu0 %v969_v42 }
  0x45   : > { %1002 = vmatprep.subr.bf16.mxu1 %v1001_v43 }
  0x47   : > { %972 = vmatpush3.bf16.msra.mxu0 %v969_v42 }
  0x48   : > { %1004 = vmatpush3.bf16.msra.mxu1 %v1001_v43  ;;  %974 = vmatprep.subr.bf16.mxu0 %v973_v48 }
  0x49   : > { %1006 = vmatprep.subr.bf16.mxu1 %v1005_v49 }
  0x4b   : > { %976 = vmatpush3.bf16.msra.mxu0 %v973_v48 }
  0x4c   : > { %1008 = vmatpush3.bf16.msra.mxu1 %v1005_v49  ;;  %1010 = vmatprep.subr.bf16.mxu0 %v1009_v54 }
  0x4d   : > { %1042 = vmatprep.subr.bf16.mxu1 %v1041_v55 }
  0x4e   : > { %838 = vmatmul.mubr.f32.vlgmr.msra.gmra.mrb[0].mxu0 %v1311_v60 }
  0x4f   : > { %873 = vmatmul.mubr.f32.vlgmr.msra.gmra.mrb[0].mxu1 %v1314_v61  ;;  %1012 = vmatpush3.bf16.msra.mxu0 %v1009_v54 }
  0x50   : > { %1044 = vmatpush3.bf16.msra.mxu1 %v1041_v55  ;;  %1014 = vmatprep.subr.bf16.mxu0 %v1013_v62 }
  0x51   : > { %1046 = vmatprep.subr.bf16.mxu1 %v1045_v63  ;;  %907 = vmatprep.mubr.f32.mxu0 %v1281_v26  ;;  %v723_v26 = vld [vmem:[%s1244_s23 + $0x1e0] sm:$0xff] }
  0x52   : > { %942 = vmatprep.mubr.f32.mxu1 %v1287_v29  ;;  %v1065_v29 = vpack.c.bf16 %v724_v27, %v723_v26 }
  0x53   : > { %1016 = vmatpush3.bf16.msra.mxu0 %v1013_v62 }
  0x54   : > { %1048 = vmatpush3.bf16.msra.mxu1 %v1045_v63  ;;  %1018 = vmatprep.subr.bf16.mxu0 %v1017_v4 }
  0x55   : > { %1050 = vmatprep.subr.bf16.mxu1 %v1049_v5 }
  0x57   : > { %1020 = vmatpush3.bf16.msra.mxu0 %v1017_v4 }
  0x58   : > { %1052 = vmatpush3.bf16.msra.mxu1 %v1049_v5  ;;  %1022 = vmatprep.subr.bf16.mxu0 %v1021_v10 }
  0x59   : > { %1054 = vmatprep.subr.bf16.mxu1 %v1053_v11 }
  0x5b   : > { %1024 = vmatpush3.bf16.msra.mxu0 %v1021_v10 }
  0x5c   : > { %1056 = vmatpush3.bf16.msra.mxu1 %v1053_v11  ;;  %1026 = vmatprep.subr.bf16.mxu0 %v1025_v16 }
  0x5d   : > { %1058 = vmatprep.subr.bf16.mxu1 %v1057_v17 }
  0x5f   : > { %1028 = vmatpush3.bf16.msra.mxu0 %v1025_v16 }
  0x60   : > { %1060 = vmatpush3.bf16.msra.mxu1 %v1057_v17  ;;  %1030 = vmatprep.subr.bf16.mxu0 %v1029_v22 }
  0x61   : > { %1062 = vmatprep.subr.bf16.mxu1 %v1061_v23 }
  0x63   : > { %1032 = vmatpush3.bf16.msra.mxu0 %v1029_v22 }
  0x64   : > { %1064 = vmatpush3.bf16.msra.mxu1 %v1061_v23  ;;  %1034 = vmatprep.subr.bf16.mxu0 %v1033_v28 }
  0x65   : > { %1066 = vmatprep.subr.bf16.mxu1 %v1065_v29 }
  0x67   : > { %1036 = vmatpush3.bf16.msra.mxu0 %v1033_v28 }
  0x68   : > { %1068 = vmatpush3.bf16.msra.mxu1 %v1065_v29  ;;  %1038 = vmatprep.subr.bf16.mxu0 %v1037_v34 }
  0x69   : > { %1070 = vmatprep.subr.bf16.mxu1 %v1069_v35 }
  0x6b   : > { %1040 = vmatpush3.bf16.msra.mxu0 %v1037_v34 }
  0x6c   : > { %1072 = vmatpush3.bf16.msra.mxu1 %v1069_v35 }
  0x6e   : > { %908 = vmatmul.mubr.f32.vlgmr.msra.gmra.mrb[2].mxu0 %v1311_v60 }
  0x6f   : > { %943 = vmatmul.mubr.f32.vlgmr.msra.gmra.mrb[2].mxu1 %v1314_v61 }
 0x121   : > { %v839_v36 = vpop.f32.mrb[0].mxu0 }
 0x122   : > { %v354_v37 = vpop.f32.mrb[1].mxu0  ;;  %v874_v38 = vpop.f32.mrb[0].mxu1 }
 0x123   : > { %v429_v39 = vpop.f32.mrb[1].mxu1 }
 0x141   : > { %v909_v40 = vpop.f32.mrb[2].mxu0 }
 0x142   : > { %v588_v41 = vsub.f32 %v354_v37, %v909_v40  ;;  %v944_v42 = vpop.f32.mrb[2].mxu1  ;;  %v504_v43 = vpop.f32.mrb[3].mxu0 }
 0x143   : > { %v589_v44 = vsub.f32 %v429_v39, %v944_v42  ;;  %v592_v45 = vadd.f32 %v839_v36, %v504_v43  ;;  %v579_v46 = vpop.f32.mrb[3].mxu1 }
 0x144   : > { %590 = vst [vmem:[%s217_s26] sm:$0xff] %v588_v41  ;;  %v593_v47 = vadd.f32 %v874_v38, %v579_v46 }
 0x145   : > { %591 = vst [vmem:[%s217_s26 + $0x10] sm:$0xff] %v589_v44  ;;  %594 = vst [vmem:[%s217_s26 + $0x8] sm:$0xff] %v592_v45 }
 0x146   : > { %595 = vst [vmem:[%s217_s26 + $0x18] sm:$0xff] %v593_v47 }
 0x147 PF: > { %p12_p12 = scmp.ge.s32.totalorder %s1197_s14, 6   ;;  %s1369_s9 = smov %s1146_s10 }
 0x148   : > { %s1370_s10 = smov %s1150_s11  ;;  %s1371_s11 = smov %s1207_s17 }
 0x149   : > { %s1372_s12 = smov %s1197_s14  ;;  %14 = sbr.rel (!%p12_p12) target bundleno = 3 (0x3), region = 77 }
 0x150   :  { %620 = vsyncpa [#allocation3], 1 }
 0x151   :  { %622 = vsyncpa [#allocation3 + $0x1], 1 }

</bundles_post_ra>
